<compile_context>
chip_gen: v6e
topology: v6e:2x2x1
jax: 0.10.0
libtpu: 0.0.40
codegen_flags: <defaults>
</compile_context>

<pallas_src>
import functools

import jax
import jax.numpy as jnp
from jax.experimental import pallas as pl
from jax.experimental.pallas import tpu as pltpu

CLASS_NUMS = 5     # hard-coded in the PyTorch module (class_nums = 5)
SMOOTH = 1.0
_LANE = 128
# ~2.5 MiB of double-buffered f32 logits per tile at TR=512: fits v5e's 16 MiB scoped
# VMEM default, v6e's 32 MiB and v7x's 64 MiB physical with plenty of headroom.
_TR_CAP = 512


def _dice_stats_kernel(x_ref, t_ref, o_ref, *, total_rows, num_classes, masked):
    """Accumulates per-(batch, class) lane-partial dice statistics.

    x_ref : (1, C, TR, 128)  logits block (native dtype)
    t_ref : (1, TR, 128)     int8 class-index target block (-1 = padding)
    o_ref : (1, 3*C, 128)    f32 accumulator; rows [0:C)=intersection,
                             [C:2C)=sum(prob), [2C:3C)=target count
    """
    C = num_classes
    li = pl.program_id(1)
    TR = t_ref.shape[1]
    lanes = t_ref.shape[2]

    t = t_ref[0].astype(jnp.int32)                                   # (TR, 128)

    if masked:
        row = jax.lax.broadcasted_iota(jnp.int32, (TR, lanes), 0) + li * TR
        valid = (row < total_rows) & (t >= 0)
        validf = valid.astype(jnp.float32)
        # Mask BEFORE any arithmetic so garbage in padded/remainder lanes can never
        # produce NaN/Inf that survives a multiply-by-zero.
        xs = [jnp.where(valid, x_ref[0, i].astype(jnp.float32), 0.0)
              for i in range(C)]
    else:
        validf = None
        xs = [x_ref[0, i].astype(jnp.float32) for i in range(C)]

    # Numerically stable softmax over the class axis, fully class-unrolled:
    # pairwise VPU max/add chains on dense (TR, 128) slabs.
    m = xs[0]
    for i in range(1, C):
        m = jnp.maximum(m, xs[i])
    es = [jnp.exp(xi - m) for xi in xs]
    denom = es[0]
    for i in range(1, C):
        denom = denom + es[i]
    inv = pl.reciprocal(denom, approx=True)
    ps = [e * inv for e in es]

    inter_rows, sump_rows, cnt_rows = [], [], []
    for i in range(C):
        if masked:
            tgt = jnp.where(t == i, validf, 0.0)     # (t == i) & valid, as f32
            sp = ps[i] * validf
        else:
            tgt = (t == i).astype(jnp.float32)
            sp = ps[i]
        # Sublane-only reductions -> 128-lane partials; the cross-lane reduce is
        # deferred to the (tiny) wrapper-side finalization.
        inter_rows.append(jnp.sum(ps[i] * tgt, axis=0, keepdims=True))
        sump_rows.append(jnp.sum(sp, axis=0, keepdims=True))
        cnt_rows.append(jnp.sum(tgt, axis=0, keepdims=True))

    contrib = jnp.concatenate(inter_rows + sump_rows + cnt_rows, axis=0)[None]

    @pl.when(li == 0)
    def _():
        o_ref[...] = jnp.zeros_like(o_ref)

    o_ref[...] += contrib


def multiclass_dice_loss(logits_nchw, target_nhw, weights=None, *, tile_rows=None):
    """logits_nchw: (N, C, H, W) logits (f32/bf16); target_nhw: (N, H, W) int class ids."""
    N, C, H, W = logits_nchw.shape
    assert C == CLASS_NUMS, "PyTorch module hard-codes one_hot(target, 5)"
    L = H * W

    # Reproduce PyTorch's one_hot(target,5).transpose(3,1): probabilities are flattened
    # (h,w)-major while the one-hot target is flattened (w,h)-major.  The transpose is
    # done on int8 data (tiny vs. the logit stream).
    t = jnp.transpose(target_nhw.astype(jnp.int8), (0, 2, 1)).reshape(N, L)
    x = logits_nchw.reshape(N, C, L)          # free reshape, native dtype

    # Fold L into (rows, 128) so per-class slabs are dense (sublane, lane) 2-D tiles.
    Lp = pl.cdiv(L, _LANE) * _LANE
    if Lp != L:
        x = jnp.pad(x, ((0, 0), (0, 0), (0, Lp - L)))
        t = jnp.pad(t, ((0, 0), (0, Lp - L)), constant_values=-1)   # -1 = "ignore"
    nR = Lp // _LANE
    x = x.reshape(N, C, nR, _LANE)
    t = t.reshape(N, nR, _LANE)

    cap = _TR_CAP if tile_rows is None else tile_rows
    if nR <= cap:
        TR = nR                                   # full-dim block (always legal)
    else:
        TR = max(32, (cap // 32) * 32)            # keep f32/int8 sublane tiling happy
    num_l = pl.cdiv(nR, TR)
    masked = (Lp != L) or (nR % TR != 0)

    kernel = functools.partial(
        _dice_stats_kernel, total_rows=nR, num_classes=C, masked=masked)

    elems = N * C * Lp
    stats = pl.pallas_call(
        kernel,
        out_shape=jax.ShapeDtypeStruct((N, 3 * C, _LANE), jnp.float32),
        grid_spec=pltpu.PrefetchScalarGridSpec(
            num_scalar_prefetch=0,
            grid=(N, num_l),
            in_specs=[
                pl.BlockSpec((1, C, TR, _LANE), lambda n, l: (n, 0, l, 0)),
                pl.BlockSpec((1, TR, _LANE), lambda n, l: (n, l, 0)),
            ],
            out_specs=pl.BlockSpec((1, 3 * C, _LANE), lambda n, l: (n, 0, 0)),
        ),
        compiler_params=pltpu.CompilerParams(
            dimension_semantics=("parallel", "arbitrary"),
            vmem_limit_bytes=32 * 1024 * 1024,
        ),
        cost_estimate=pl.CostEstimate(
            flops=15 * elems,
            transcendentals=elems + N * Lp,
            bytes_accessed=(x.size * x.dtype.itemsize + t.size
                            + N * 3 * C * _LANE * 4),
        ),
    )(x, t)

    # Finalize (tiny) in the wrapper: cross-lane reduce of the partials + dice math.
    stats_sum = jnp.sum(stats, axis=-1)                       # (N, 3*C)
    inter = stats_sum[:, 0:C]
    sum_p = stats_sum[:, C:2 * C]
    cnt_t = stats_sum[:, 2 * C:3 * C]
    dice = 2.0 * (inter + SMOOTH) / (sum_p + cnt_t + SMOOTH)  # (N, C)
    per_class_loss = 1.0 - jnp.sum(dice, axis=0) / N          # (C,)
    if weights is not None:
        per_class_loss = per_class_loss * jnp.asarray(weights, jnp.float32)
    return jnp.sum(per_class_loss)


def _reference(input_nchw, target_nhw):
    """Pure-JAX replica of the PyTorch forward (for verification)."""
    N, C, H, W = input_nchw.shape
    p = jax.nn.softmax(input_nchw.astype(jnp.float32), axis=1)
    onehot = jax.nn.one_hot(target_nhw, CLASS_NUMS)                 # (N, H, W, 5)
    onehot_t = jnp.transpose(onehot, (0, 3, 2, 1))                  # (N, 5, W, H)
    total = 0.0
    for i in range(CLASS_NUMS):
        inp = p[:, i].reshape(N, -1)
        tgt = onehot_t[:, i].reshape(N, -1)
        inter = jnp.sum(inp * tgt, axis=1)
        dice = 2.0 * (inter + SMOOTH) / (jnp.sum(inp, 1) + jnp.sum(tgt, 1) + SMOOTH)
        total = total + (1.0 - jnp.sum(dice) / N)
    return total


if __name__ == "__main__":
    key = jax.random.PRNGKey(0)
    k1, k2, k3, k4, k5, k6 = jax.random.split(key, 6)
    TOL = dict(rtol=5e-3, atol=5e-3)   # pl.reciprocal(approx=True) in the softmax

    # Case 1: small aligned shape (single tile, no masking).
    N, C, H, W = 2, CLASS_NUMS, 16, 16
    logits = jax.random.normal(k1, (N, C, H, W), dtype=jnp.float32)
    target = jax.random.randint(k2, (N, H, W), 0, CLASS_NUMS, dtype=jnp.int32)
    loss = jax.block_until_ready(multiclass_dice_loss(logits, target))
    ref = jax.block_until_ready(_reference(logits, target))
    assert jnp.allclose(loss, ref, **TOL), (loss, ref)

    # Case 2: multiple row tiles with a remainder tile (row masking path).
    logits2 = jax.random.normal(k3, (2, CLASS_NUMS, 80, 80), dtype=jnp.float32)
    target2 = jax.random.randint(k4, (2, 80, 80), 0, CLASS_NUMS, dtype=jnp.int32)
    loss2 = jax.block_until_ready(multiclass_dice_loss(logits2, target2, tile_rows=32))
    ref2 = jax.block_until_ready(_reference(logits2, target2))
    assert jnp.allclose(loss2, ref2, **TOL), (loss2, ref2)

    # Case 3: non-square H/W with L % 128 != 0 (lane-padding + sentinel masking path).
    logits3 = jax.random.normal(k5, (2, CLASS_NUMS, 12, 10), dtype=jnp.float32)
    target3 = jax.random.randint(k6, (2, 12, 10), 0, CLASS_NUMS, dtype=jnp.int32)
    loss3 = jax.block_until_ready(multiclass_dice_loss(logits3, target3))
    ref3 = jax.block_until_ready(_reference(logits3, target3))
    assert jnp.allclose(loss3, ref3, **TOL), (loss3, ref3)

    print("KERNEL_OK")
</pallas_src>

<mosaic_0001>
module attributes {stable_mosaic.version = 11 : i64} {
  func.func @_dice_stats_kernel(%arg0: i32, %arg1: i32, %arg2: memref<1x5x2x128xf32, #tpu.memory_space<vmem>>, %arg3: memref<1x2x128xi8, #tpu.memory_space<vmem>>, %arg4: memref<1x15x128xf32, #tpu.memory_space<vmem>>) attributes {dimension_semantics = [#tpu.dimension_semantics<parallel>, #tpu.dimension_semantics<arbitrary>], iteration_bounds = array<i64: 2, 1>, scalar_prefetch = 0 : i64, scratch_operands = 0 : i64, tpu.core_type = #tpu.core_type<tc>, window_params = [{transform_indices = @transform_0, window_bounds = array<i64: 1, 5, 2, 128>}, {transform_indices = @transform_1, window_bounds = array<i64: 1, 2, 128>}, {transform_indices = @transform_2, window_bounds = array<i64: 1, 15, 128>}]} {
    %c0 = arith.constant 0 : index
    %c0_0 = arith.constant 0 : index
    %c0_1 = arith.constant 0 : index
    %0 = vector.load %arg3[%c0, %c0_0, %c0_1] : memref<1x2x128xi8, #tpu.memory_space<vmem>>, vector<1x2x128xi8>
    %1 = vector.shape_cast %0 : vector<1x2x128xi8> to vector<2x128xi8>
    %2 = arith.extsi %1 : vector<2x128xi8> to vector<2x128xi32>
    %c0_2 = arith.constant 0 : index
    %c0_3 = arith.constant 0 : index
    %c0_4 = arith.constant 0 : index
    %c0_5 = arith.constant 0 : index
    %3 = vector.load %arg2[%c0_2, %c0_3, %c0_4, %c0_5] : memref<1x5x2x128xf32, #tpu.memory_space<vmem>>, vector<1x1x2x128xf32>
    %4 = vector.shape_cast %3 : vector<1x1x2x128xf32> to vector<2x128xf32>
    %c0_6 = arith.constant 0 : index
    %c1 = arith.constant 1 : index
    %c0_7 = arith.constant 0 : index
    %c0_8 = arith.constant 0 : index
    %5 = vector.load %arg2[%c0_6, %c1, %c0_7, %c0_8] : memref<1x5x2x128xf32, #tpu.memory_space<vmem>>, vector<1x1x2x128xf32>
    %6 = vector.shape_cast %5 : vector<1x1x2x128xf32> to vector<2x128xf32>
    %c0_9 = arith.constant 0 : index
    %c2 = arith.constant 2 : index
    %c0_10 = arith.constant 0 : index
    %c0_11 = arith.constant 0 : index
    %7 = vector.load %arg2[%c0_9, %c2, %c0_10, %c0_11] : memref<1x5x2x128xf32, #tpu.memory_space<vmem>>, vector<1x1x2x128xf32>
    %8 = vector.shape_cast %7 : vector<1x1x2x128xf32> to vector<2x128xf32>
    %c0_12 = arith.constant 0 : index
    %c3 = arith.constant 3 : index
    %c0_13 = arith.constant 0 : index
    %c0_14 = arith.constant 0 : index
    %9 = vector.load %arg2[%c0_12, %c3, %c0_13, %c0_14] : memref<1x5x2x128xf32, #tpu.memory_space<vmem>>, vector<1x1x2x128xf32>
    %10 = vector.shape_cast %9 : vector<1x1x2x128xf32> to vector<2x128xf32>
    %c0_15 = arith.constant 0 : index
    %c4 = arith.constant 4 : index
    %c0_16 = arith.constant 0 : index
    %c0_17 = arith.constant 0 : index
    %11 = vector.load %arg2[%c0_15, %c4, %c0_16, %c0_17] : memref<1x5x2x128xf32, #tpu.memory_space<vmem>>, vector<1x1x2x128xf32>
    %12 = vector.shape_cast %11 : vector<1x1x2x128xf32> to vector<2x128xf32>
    %13 = arith.maximumf %4, %6 : vector<2x128xf32>
    %14 = arith.maximumf %13, %8 : vector<2x128xf32>
    %15 = arith.maximumf %14, %10 : vector<2x128xf32>
    %16 = arith.maximumf %15, %12 : vector<2x128xf32>
    %17 = arith.subf %4, %16 : vector<2x128xf32>
    %18 = math.exp %17 : vector<2x128xf32>
    %19 = arith.subf %6, %16 : vector<2x128xf32>
    %20 = math.exp %19 : vector<2x128xf32>
    %21 = arith.subf %8, %16 : vector<2x128xf32>
    %22 = math.exp %21 : vector<2x128xf32>
    %23 = arith.subf %10, %16 : vector<2x128xf32>
    %24 = math.exp %23 : vector<2x128xf32>
    %25 = arith.subf %12, %16 : vector<2x128xf32>
    %26 = math.exp %25 : vector<2x128xf32>
    %27 = arith.addf %18, %20 : vector<2x128xf32>
    %28 = arith.addf %27, %22 : vector<2x128xf32>
    %29 = arith.addf %28, %24 : vector<2x128xf32>
    %30 = arith.addf %29, %26 : vector<2x128xf32>
    %31 = tpu.reciprocal %30 {approx = true} : vector<2x128xf32> -> vector<2x128xf32>
    %32 = arith.mulf %18, %31 : vector<2x128xf32>
    %33 = arith.mulf %20, %31 : vector<2x128xf32>
    %34 = arith.mulf %22, %31 : vector<2x128xf32>
    %35 = arith.mulf %24, %31 : vector<2x128xf32>
    %36 = arith.mulf %26, %31 : vector<2x128xf32>
    %c0_i32 = arith.constant 0 : i32
    %37 = vector.broadcast %c0_i32 : i32 to vector<2x128xi32>
    %38 = arith.cmpi eq, %2, %37 : vector<2x128xi32>
    %39 = arith.extui %38 : vector<2x128xi1> to vector<2x128xi32>
    %40 = arith.sitofp %39 : vector<2x128xi32> to vector<2x128xf32>
    %41 = arith.mulf %32, %40 : vector<2x128xf32>
    %cst = arith.constant dense<0.000000e+00> : vector<128xf32>
    %42 = vector.multi_reduction <add>, %41, %cst [0] : vector<2x128xf32> to vector<128xf32>
    %43 = vector.shape_cast %42 : vector<128xf32> to vector<1x128xf32>
    %cst_18 = arith.constant dense<0.000000e+00> : vector<128xf32>
    %44 = vector.multi_reduction <add>, %32, %cst_18 [0] : vector<2x128xf32> to vector<128xf32>
    %45 = vector.shape_cast %44 : vector<128xf32> to vector<1x128xf32>
    %cst_19 = arith.constant dense<0.000000e+00> : vector<128xf32>
    %46 = vector.multi_reduction <add>, %40, %cst_19 [0] : vector<2x128xf32> to vector<128xf32>
    %47 = vector.shape_cast %46 : vector<128xf32> to vector<1x128xf32>
    %c1_i32 = arith.constant 1 : i32
    %48 = vector.broadcast %c1_i32 : i32 to vector<2x128xi32>
    %49 = arith.cmpi eq, %2, %48 : vector<2x128xi32>
    %50 = arith.extui %49 : vector<2x128xi1> to vector<2x128xi32>
    %51 = arith.sitofp %50 : vector<2x128xi32> to vector<2x128xf32>
    %52 = arith.mulf %33, %51 : vector<2x128xf32>
    %cst_20 = arith.constant dense<0.000000e+00> : vector<128xf32>
    %53 = vector.multi_reduction <add>, %52, %cst_20 [0] : vector<2x128xf32> to vector<128xf32>
    %54 = vector.shape_cast %53 : vector<128xf32> to vector<1x128xf32>
    %cst_21 = arith.constant dense<0.000000e+00> : vector<128xf32>
    %55 = vector.multi_reduction <add>, %33, %cst_21 [0] : vector<2x128xf32> to vector<128xf32>
    %56 = vector.shape_cast %55 : vector<128xf32> to vector<1x128xf32>
    %cst_22 = arith.constant dense<0.000000e+00> : vector<128xf32>
    %57 = vector.multi_reduction <add>, %51, %cst_22 [0] : vector<2x128xf32> to vector<128xf32>
    %58 = vector.shape_cast %57 : vector<128xf32> to vector<1x128xf32>
    %c2_i32 = arith.constant 2 : i32
    %59 = vector.broadcast %c2_i32 : i32 to vector<2x128xi32>
    %60 = arith.cmpi eq, %2, %59 : vector<2x128xi32>
    %61 = arith.extui %60 : vector<2x128xi1> to vector<2x128xi32>
    %62 = arith.sitofp %61 : vector<2x128xi32> to vector<2x128xf32>
    %63 = arith.mulf %34, %62 : vector<2x128xf32>
    %cst_23 = arith.constant dense<0.000000e+00> : vector<128xf32>
    %64 = vector.multi_reduction <add>, %63, %cst_23 [0] : vector<2x128xf32> to vector<128xf32>
    %65 = vector.shape_cast %64 : vector<128xf32> to vector<1x128xf32>
    %cst_24 = arith.constant dense<0.000000e+00> : vector<128xf32>
    %66 = vector.multi_reduction <add>, %34, %cst_24 [0] : vector<2x128xf32> to vector<128xf32>
    %67 = vector.shape_cast %66 : vector<128xf32> to vector<1x128xf32>
    %cst_25 = arith.constant dense<0.000000e+00> : vector<128xf32>
    %68 = vector.multi_reduction <add>, %62, %cst_25 [0] : vector<2x128xf32> to vector<128xf32>
    %69 = vector.shape_cast %68 : vector<128xf32> to vector<1x128xf32>
    %c3_i32 = arith.constant 3 : i32
    %70 = vector.broadcast %c3_i32 : i32 to vector<2x128xi32>
    %71 = arith.cmpi eq, %2, %70 : vector<2x128xi32>
    %72 = arith.extui %71 : vector<2x128xi1> to vector<2x128xi32>
    %73 = arith.sitofp %72 : vector<2x128xi32> to vector<2x128xf32>
    %74 = arith.mulf %35, %73 : vector<2x128xf32>
    %cst_26 = arith.constant dense<0.000000e+00> : vector<128xf32>
    %75 = vector.multi_reduction <add>, %74, %cst_26 [0] : vector<2x128xf32> to vector<128xf32>
    %76 = vector.shape_cast %75 : vector<128xf32> to vector<1x128xf32>
    %cst_27 = arith.constant dense<0.000000e+00> : vector<128xf32>
    %77 = vector.multi_reduction <add>, %35, %cst_27 [0] : vector<2x128xf32> to vector<128xf32>
    %78 = vector.shape_cast %77 : vector<128xf32> to vector<1x128xf32>
    %cst_28 = arith.constant dense<0.000000e+00> : vector<128xf32>
    %79 = vector.multi_reduction <add>, %73, %cst_28 [0] : vector<2x128xf32> to vector<128xf32>
    %80 = vector.shape_cast %79 : vector<128xf32> to vector<1x128xf32>
    %c4_i32 = arith.constant 4 : i32
    %81 = vector.broadcast %c4_i32 : i32 to vector<2x128xi32>
    %82 = arith.cmpi eq, %2, %81 : vector<2x128xi32>
    %83 = arith.extui %82 : vector<2x128xi1> to vector<2x128xi32>
    %84 = arith.sitofp %83 : vector<2x128xi32> to vector<2x128xf32>
    %85 = arith.mulf %36, %84 : vector<2x128xf32>
    %cst_29 = arith.constant dense<0.000000e+00> : vector<128xf32>
    %86 = vector.multi_reduction <add>, %85, %cst_29 [0] : vector<2x128xf32> to vector<128xf32>
    %87 = vector.shape_cast %86 : vector<128xf32> to vector<1x128xf32>
    %cst_30 = arith.constant dense<0.000000e+00> : vector<128xf32>
    %88 = vector.multi_reduction <add>, %36, %cst_30 [0] : vector<2x128xf32> to vector<128xf32>
    %89 = vector.shape_cast %88 : vector<128xf32> to vector<1x128xf32>
    %cst_31 = arith.constant dense<0.000000e+00> : vector<128xf32>
    %90 = vector.multi_reduction <add>, %84, %cst_31 [0] : vector<2x128xf32> to vector<128xf32>
    %91 = vector.shape_cast %90 : vector<128xf32> to vector<1x128xf32>
    %92 = tpu.concatenate %43, %54, %65, %76, %87, %45, %56, %67, %78, %89, %47, %58, %69, %80, %91 in 0 : vector<1x128xf32>, vector<1x128xf32>, vector<1x128xf32>, vector<1x128xf32>, vector<1x128xf32>, vector<1x128xf32>, vector<1x128xf32>, vector<1x128xf32>, vector<1x128xf32>, vector<1x128xf32>, vector<1x128xf32>, vector<1x128xf32>, vector<1x128xf32>, vector<1x128xf32>, vector<1x128xf32> -> vector<15x128xf32>
    %93 = vector.shape_cast %92 : vector<15x128xf32> to vector<1x15x128xf32>
    %c0_i32_32 = arith.constant 0 : i32
    %94 = arith.cmpi eq, %arg1, %c0_i32_32 : i32
    %95 = arith.extui %94 : i1 to i32
    %c0_i32_33 = arith.constant 0 : i32
    %96 = arith.cmpi ne, %95, %c0_i32_33 : i32
    scf.if %96 {
      %cst_40 = arith.constant 0.000000e+00 : f32
      %100 = vector.broadcast %cst_40 : f32 to vector<1x15x128xf32>
      %c0_41 = arith.constant 0 : index
      %c0_42 = arith.constant 0 : index
      %c0_43 = arith.constant 0 : index
      %101 = vector.load %arg4[%c0_41, %c0_42, %c0_43] : memref<1x15x128xf32, #tpu.memory_space<vmem>>, vector<1x15x128xf32>
      tpu.vector_store %arg4[%c0_41, %c0_42, %c0_43], %100 {strides = array<i32>} : memref<1x15x128xf32, #tpu.memory_space<vmem>>, vector<1x15x128xf32>,
    } else {
    }
    %c0_34 = arith.constant 0 : index
    %c0_35 = arith.constant 0 : index
    %c0_36 = arith.constant 0 : index
    %97 = vector.load %arg4[%c0_34, %c0_35, %c0_36] : memref<1x15x128xf32, #tpu.memory_space<vmem>>, vector<1x15x128xf32>
    %98 = arith.addf %97, %93 : vector<1x15x128xf32>
    %c0_37 = arith.constant 0 : index
    %c0_38 = arith.constant 0 : index
    %c0_39 = arith.constant 0 : index
    %99 = vector.load %arg4[%c0_37, %c0_38, %c0_39] : memref<1x15x128xf32, #tpu.memory_space<vmem>>, vector<1x15x128xf32>
    tpu.vector_store %arg4[%c0_37, %c0_38, %c0_39], %98 {strides = array<i32>} : memref<1x15x128xf32, #tpu.memory_space<vmem>>, vector<1x15x128xf32>,
    return
  }
  func.func @transform_0(%arg0: i32, %arg1: i32) -> (i32, i32, i32, i32) {
    %c0_i32 = arith.constant 0 : i32
    %c0_i32_0 = arith.constant 0 : i32
    %c0_i32_1 = arith.constant 0 : i32
    return %arg0, %c0_i32, %arg1, %c0_i32_0 : i32, i32, i32, i32
  }
  func.func @transform_1(%arg0: i32, %arg1: i32) -> (i32, i32, i32) {
    %c0_i32 = arith.constant 0 : i32
    %c0_i32_0 = arith.constant 0 : i32
    return %arg0, %arg1, %c0_i32 : i32, i32, i32
  }
  func.func @transform_2(%arg0: i32, %arg1: i32) -> (i32, i32, i32) {
    %c0_i32 = arith.constant 0 : i32
    %c0_i32_0 = arith.constant 0 : i32
    %c0_i32_1 = arith.constant 0 : i32
    return %arg0, %c0_i32, %c0_i32_0 : i32, i32, i32
  }
}

</mosaic_0001>

<bundles_post_ra>
// kernel: tpu_custom_call.1
= control target key start
LH: loop header
LB: loop body
LE: loop exit
PB: predicated region body
PF: predicated region fallthrough
CT: control target
= control target key end

     0   :  { %7 = vsyncpa [#allocation3], 0  ;;  %s931_s0 = inlined_call_operand.hbm [shape: f32[2,5,2,128], index: 0, kind: input, shape index: {}]   ;;  %s932_s1 = inlined_call_operand.hbm [shape: s8[2,2,128], index: 1, kind: input, shape index: {}]   ;;  %s933_s2 = inlined_call_operand.vmem [shape: f32[2,15,128], index: 2, kind: output, shape index: {}]  }
   0x1   :  { %9 = vsyncpa [#allocation3 + $0x1], 0 }
   0x2   :  { %10 = vsyncpa [#allocation5], 0 }
   0x3   :  { %12 = vsyncpa [#allocation5 + $0x1], 0  ;;  %s742_s9 = smov 0   ;;  %s744_s10 = smov 0  }
   0x4   :  { %s746_s11 = smov 0   ;;  %s748_s12 = smov 0  }
   0x5   :  { %s750_s13 = smov 0   ;;  %s752_s14 = smov 0  }
   0x6 LB: > { %s511_s15 = sadd.s32 4294967295, %s720_s14   ;;  %s30_s16 = sadd.s32 1, %s716_s13  ;;  %s720_s14 = sphi %s752_s14, %s18_s14   ;;  %s716_s13 = sphi %s750_s13, %s941_s13   ;;  %s712_s12 = sphi %s748_s12, %s940_s12   ;;  %s708_s11 = sphi %s746_s11, %s939_s11   ;;  %s704_s10 = sphi %s744_s10, %s938_s10   ;;  %s700_s9 = sphi %s742_s9, %s937_s9  }
   0x7   : > { %p32_p0 = scmp.ge.s32.totalorder %s30_s16, 2  ;;  %s39_s17 = sadd.s32 1, %s708_s11 }
   0x8   : > { %p46_p1 = scmp.ne.s32.totalorder %s708_s11, %s704_s10  ;;  %p47_p2 = scmp.eq.s32.totalorder %s720_s14, 0 }
   0x9   : > { %s943_s16 = smov (%p32_p0, %s30_s16), 0  ;;  %p52_p4 = scmp.ne.s32.totalorder %s704_s10, %s700_s9 }
   0xa   : > { %p48_p3 = por %p47_p2, %p46_p1  ;;  %s34_s18 = ssub.s32 %s716_s13, %s943_s16 }
   0xb   : > { %p53_p5 = scmp.eq.s32.totalorder %s511_s15, 0  ;;  %p37_p6 = scmp.eq.s32.totalorder %s34_s18, 0 }
   0xc   : > { %p546_p8 = scmp.lt.s32.totalorder %s720_s14, 2  ;;  %s790_s21 = sand.u32 1, %s708_s11  }
   0xd   : > { %p781_p7 = por %p53_p5, %p52_p4  ;;  %s533_s22 = smul.u32 160, %s716_s13 }
   0xe   : > { %s787_s20 = scalar_select %p37_p6, %s708_s11, %s39_s17  }
   0xf   : > { %s532_s23 = smul.u32 10, %s790_s21  ;;  %s141_s26 = scalar_lea.hbm %s931_s0, %s533_s22 }
  0x10   : > { %p797_p9 = pnand %p546_p8, %p48_p3  ;;  %s131_s30 = scalar_lea.sflag [#allocation3], %s790_s21 }
  0x11   : > { %s134_s28 = scalar_lea.vmem [#allocation2], %s532_s23  ;;  %s722_s4 = smov [#allocation2]  }
  0x12   : > { %s142_s29 = sshll.u32 %s134_s28, 4  ;;  %p612_p10 = pneg %p797_p9  ;;  %s143_s29 = int_to_ptr.vmem [resolvable:$true] %s142_s29 }
  0x13   : > { %s623_s3 = scalar_lea.vmem %s143_s29, 160  ;;  %s628_s5 = sshll.u32 %s722_s4, 4  ;;  %s629_s5 = int_to_ptr.vmem [resolvable:$false] %s628_s5 }
  0x14   : > { %p624_p11 = scmp.ne.s32.totalorder %s143_s29, %s623_s3  ;;  %s630_s6 = scalar_lea.vmem %s629_s5, 320 }
  0x15   : > { %p631_p0 = scmp.lt.s32.totalorder %s143_s29, %s629_s5  ;;  %p632_p1 = scmp.lt.s32.totalorder %s630_s6, %s623_s3 }
  0x16   : > { %p626_p12 = pnand %p624_p11, %p612_p10 }
  0x17   : > { %p633_p2 = por %p632_p1, %p631_p0 }
  0x18   : > { %p627_p13 = pneg %p626_p12 }
  0x1a   : > { %p634_p3 = pnand %p633_p2, %p627_p13 }
  0x1c   : > { %637 = shalt.err (!%p634_p3)
}
  0x1d   : > { %s723_s7 = smov 32   ;;  %s724_s8 = smov 2  }
  0x1e   : > { %542 = dma.hbm_to_vmem [thread:$0]  (!%p797_p9), %s141_s26, 160, %s143_s29, %s131_s30, %s723_s7, %s723_s7, %s724_s8  }
  0x1f   : > { %p517_p4 = scmp.ge.s32.totalorder %s720_s14, 1  ;;  %p168_p5 = scmp.lt.s32.totalorder %s720_s14, 3 }
  0x20   : > { %s516_s15 = sshll.u32 %s716_s13, 4  ;;  %s155_s23 = scalar_lea.vmem [#allocation4], %s790_s21 }
  0x21   : > { %p811_p6 = pnand %p517_p4, %p168_p5  ;;  %s161_s22 = scalar_lea.hbm %s932_s1, %s516_s15 }
  0x22   : > { %s163_s24 = sshll.u32 %s155_s23, 4  ;;  %s153_s25 = scalar_lea.sflag [#allocation5], %s790_s21  ;;  %s164_s24 = int_to_ptr.vmem [resolvable:$true] %s163_s24 }
  0x23   : > { %s651_s28 = scalar_lea.vmem %s164_s24, 16  ;;  %s725_s26 = smov [#allocation4]  }
  0x24   : > { %p652_p8 = scmp.ne.s32.totalorder %s164_s24, %s651_s28  ;;  %s656_s29 = sshll.u32 %s725_s26, 4  ;;  %s657_s29 = int_to_ptr.vmem [resolvable:$false] %s656_s29 }
  0x25   : > { %s658_s30 = scalar_lea.vmem %s657_s29, 32  ;;  %p659_p13 = scmp.lt.s32.totalorder %s164_s24, %s657_s29 }
  0x26   : > { %p654_p11 = pnand %p652_p8, %p612_p10  ;;  %p660_p0 = scmp.lt.s32.totalorder %s658_s30, %s651_s28 }
  0x28   : > { %p655_p12 = pneg %p654_p11  ;;  %p661_p1 = por %p660_p0, %p659_p13 }
  0x2a   : > { %p662_p2 = pnand %p661_p1, %p655_p12 }
  0x2c   : > { %665 = shalt.err (!%p662_p2)
}
  0x2d   : > { %545 = dma.hbm_to_vmem [thread:$0]  (!%p797_p9), %s161_s22, 16, %s164_s24, %s153_s25  }
  0x2e   : > { %172 = sbr.rel (%p811_p6) target bundleno = 143 (0x8f), region = 28  ;;  %s829_s21 = sand.u32 (!%p811_p6), 1, %s704_s10  }
  0x2f   : > { %s534_s3 = smul.u32 (!%p811_p6), 10, %s829_s21  ;;  %s175_s4 = scalar_lea.sflag (!%p811_p6), [#allocation3], %s829_s21 }
  0x31   : > { %s178_s5 = scalar_lea.vmem (!%p811_p6), [#allocation2], %s534_s3 }
  0x33   : > { %691 = dma.done.wait (%p781_p7), %s175_s4, 160  }
  0x34   : > { %693 = vsyncadd (%p781_p7), %s175_s4, 4294967136  ;;  %s184_s27 = scalar_lea.sflag [#allocation5], %s829_s21  ;;  %s186_s6 = scalar_lea.vmem [#allocation4], %s829_s21 }
  0x35   : > { %695 = dma.done.wait (%p781_p7), %s184_s27, 16  }
  0x36   : > { %697 = vsyncadd (%p781_p7), %s184_s27, 4294967280  ;;  %p211_p9 = scmp.lt.s32.totalorder %s712_s12, 1  ;;  %v726_v0 = vmov 0.0   ;;  %v218_v1 = vld [vmem:[%s178_s5] sm:$0x3]  ;;  %vm260_vm1 = vcmask 1041408  }
  0x37   : > { %v520_v2 = vld [vmem:[%s178_s5 + $0x2] sm:$0x3]  ;;  %v521_v3 = vld [vmem:[%s178_s5 + $0x4] sm:$0x3]  ;;  %v522_v5 = vld [vmem:[%s178_s5 + $0x6] sm:$0x3] }
  0x38   : > { %s945_s12 = smov (!%p211_p9, %s712_s12), 1  ;;  %v227_v4 = vmax.f32 %v218_v1, %v520_v2  ;;  %v523_v7 = vld [vmem:[%s178_s5 + $0x8] sm:$0x3]  ;;  %v216_v20 = vld [vmem:[%s186_s6] sm:$0x1]  ;;  %vm382_vm6 = vcmask 1040384  }
  0x39   : > { %s531_s7 = sshll.u32 %s945_s12, 4  ;;  %v217_v24 = vunpack.c.0.s8 %v216_v20  ;;  %vm385_vm7 = vcmask 1042432   ;;  %vm387_vm8 = vcmask 1043456   ;;  %vm389_vm9 = vcmask 1044480  }
  0x3a   : > { %s848_s15 = scalar_lea.vmem %s933_s2, %s531_s7  ;;  %v228_v6 = vmax.f32 %v227_v4, %v521_v3  ;;  %vm391_vm10 = vcmask 1045504   ;;  %vm393_vm11 = vcmask 1046528  }
  0x3b   : > { %406 = vst [vmem:[%s848_s15 + $0x8] sm:$0x7f] %v726_v0  ;;  %vm256_vm0 = vcmp.eq.s32.totalorder %v217_v24, 0  ;;  %vm282_vm2 = vcmp.eq.s32.totalorder %v217_v24, 1  ;;  %vm332_vm3 = vcmp.eq.s32.totalorder %v217_v24, 3  ;;  %vm307_vm4 = vcmp.eq.s32.totalorder %v217_v24, 2 }
  0x3c   : > { %v229_v8 = vmax.f32 %v228_v6, %v522_v5  ;;  %v524_v31 = vsel %vm256_vm0, 1.0, %v726_v0  ;;  %v525_v34 = vsel %vm282_vm2, 1.0, %v726_v0  ;;  %v527_v36 = vsel %vm332_vm3, 1.0, %v726_v0 }
  0x3d   : > { %v275_v32 = vsel %vm260_vm1, %v524_v31, 0.0  ;;  %v300_v35 = vsel %vm260_vm1, %v525_v34, 0.0  ;;  %v526_v37 = vsel %vm307_vm4, 1.0, %v726_v0  ;;  %v350_v39 = vsel %vm260_vm1, %v527_v36, 0.0 }
  0x3e   : > { %v230_v9 = vmax.f32 %v229_v8, %v523_v7  ;;  %v276_v33 = vrot.slane %v275_v32, 4  ;;  %v325_v38 = vsel %vm260_vm1, %v526_v37, 0.0  ;;  %v301_v41 = vrot.slane %v300_v35, 4 }
  0x3f   : > { %vm357_vm5 = vcmp.eq.s32.totalorder %v217_v24, 4  ;;  %v326_v42 = vrot.slane %v325_v38, 4  ;;  %v351_v43 = vrot.slane %v350_v39, 4 }
  0x40   : > { %v231_v10 = vsub.f32 %v218_v1, %v230_v9  ;;  %v234_v11 = vsub.f32 %v520_v2, %v230_v9  ;;  %v237_v12 = vsub.f32 %v521_v3, %v230_v9  ;;  %v240_v13 = vsub.f32 %v522_v5, %v230_v9 }
  0x41   : > { %v243_v14 = vsub.f32 %v523_v7, %v230_v9  ;;  %v277_v40 = vadd.f32 %v276_v33, %v275_v32  ;;  %v528_v44 = vsel %vm357_vm5, 1.0, %v726_v0  ;;  %v857_v46 = vadd.f32 %v301_v41, %v300_v35 }
  0x42   : > { %v232_v15 = vmul.f32 1.442695, %v231_v10  ;;  %v235_v16 = vmul.f32 1.442695, %v234_v11  ;;  %v238_v17 = vmul.f32 1.442695, %v237_v12  ;;  %v862_v49 = vadd.f32 %v326_v42, %v325_v38 }
  0x43   : > { %v241_v18 = vmul.f32 1.442695, %v240_v13  ;;  %v244_v19 = vmul.f32 1.442695, %v243_v14  ;;  %v278_v45 = vrot.slane %v277_v40, 2  ;;  %v860_v47 = vsel %vm260_vm1, %v528_v44, 0.0 }
  0x44   : > { %598 = vpow2.f32 %v232_v15  ;;  %v864_v50 = vadd.f32 %v351_v43, %v350_v39  ;;  %v303_v57 = vrot.slane %v857_v46, 2  ;;  %v376_v58 = vrot.slane %v860_v47, 4 }
  0x45   : > { %600 = vpow2.f32 %v235_v16  ;;  %v870_v56 = vadd.f32 %v278_v45, %v277_v40 }
  0x46   : > { %602 = vpow2.f32 %v238_v17  ;;  %v353_v38 = vrot.slane %v864_v50, 2  ;;  %v377_v42 = vadd.f32 %v376_v58, %v860_v47  ;;  %v304_v47 = vadd.f32 %v303_v57, %v857_v46 }
  0x47   : > { %604 = vpow2.f32 %v241_v18 }
  0x48   : > { %606 = vpow2.f32 %v244_v19 }
  0x51   : > { %v599_v21 = vpop.eup %598 }
  0x52   : > { %v601_v22 = vpop.eup %600 }
  0x53   : > { %v603_v23 = vpop.eup %602  ;;  %v246_v25 = vadd.f32 %v601_v22, %v599_v21 }
  0x54   : > { %v605_v26 = vpop.eup %604 }
  0x55   : > { %v247_v27 = vadd.f32 %v603_v23, %v246_v25  ;;  %v607_v28 = vpop.eup %606 }
  0x57   : > { %v248_v29 = vadd.f32 %v605_v26, %v247_v27 }
  0x59   : > { %v249_v30 = vadd.f32 %v607_v28, %v248_v29 }
  0x5b   : > { %608 = vrcp.f32 %v249_v30 }
  0x68   : > { %v609_v48 = vpop.eup %608 }
  0x69   : > { %v866_v51 = vmul.f32 %v609_v48, %v605_v26  ;;  %v868_v52 = vmul.f32 %v609_v48, %v607_v28  ;;  %v251_v53 = vmul.f32 %v609_v48, %v599_v21  ;;  %v252_v54 = vmul.f32 %v609_v48, %v601_v22 }
  0x6a   : > { %v253_v55 = vmul.f32 %v609_v48, %v603_v23 }
  0x6b   : > { %v335_v59 = vmul.f32 %v527_v36, %v866_v51  ;;  %v360_v60 = vmul.f32 %v528_v44, %v868_v52  ;;  %v259_v61 = vmul.f32 %v524_v31, %v251_v53  ;;  %v268_v62 = vsel %vm260_vm1, %v251_v53, 0.0 }
  0x6c   : > { %v269_v63 = vrot.slane %v268_v62, 4  ;;  %v285_v0 = vmul.f32 %v525_v34, %v252_v54  ;;  %v293_v1 = vsel %vm260_vm1, %v252_v54, 0.0  ;;  %v310_v2 = vmul.f32 %v526_v37, %v253_v55 }
  0x6d   : > { %v261_v3 = vsel %vm260_vm1, %v259_v61, 0.0  ;;  %v294_v4 = vrot.slane %v293_v1, 4  ;;  %v318_v5 = vsel %vm260_vm1, %v253_v55, 0.0  ;;  %v336_v6 = vsel %vm260_vm1, %v335_v59, 0.0 }
  0x6e   : > { %v262_v7 = vrot.slane %v261_v3, 4  ;;  %v270_v8 = vadd.f32 %v269_v63, %v268_v62  ;;  %v286_v9 = vsel %vm260_vm1, %v285_v0, 0.0  ;;  %v311_v10 = vsel %vm260_vm1, %v310_v2, 0.0 }
  0x6f   : > { %v287_v11 = vrot.slane %v286_v9, 4  ;;  %v295_v12 = vadd.f32 %v294_v4, %v293_v1  ;;  %v312_v13 = vrot.slane %v311_v10, 4  ;;  %v319_v14 = vrot.slane %v318_v5, 4 }
  0x70   : > { %v263_v15 = vadd.f32 %v262_v7, %v261_v3  ;;  %v271_v16 = vrot.slane %v270_v8, 2  ;;  %v337_v17 = vrot.slane %v336_v6, 4  ;;  %v361_v18 = vsel %vm260_vm1, %v360_v60, 0.0 }
  0x71   : > { %v288_v19 = vadd.f32 %v287_v11, %v286_v9  ;;  %v296_v20 = vrot.slane %v295_v12, 2  ;;  %v313_v21 = vadd.f32 %v312_v13, %v311_v10  ;;  %v320_v22 = vadd.f32 %v319_v14, %v318_v5 }
  0x72   : > { %v264_v23 = vrot.slane %v263_v15, 2  ;;  %v272_v24 = vadd.f32 %v271_v16, %v270_v8  ;;  %v338_v25 = vadd.f32 %v337_v17, %v336_v6  ;;  %v362_v26 = vrot.slane %v361_v18, 4 }
  0x73   : > { %v289_v27 = vrot.slane %v288_v19, 2  ;;  %v297_v28 = vadd.f32 %v296_v20, %v295_v12  ;;  %v314_v29 = vrot.slane %v313_v21, 2  ;;  %v321_v30 = vrot.slane %v320_v22, 2 }
  0x74   : > { %v265_v31 = vadd.f32 %v264_v23, %v263_v15  ;;  %v339_v32 = vrot.slane %v338_v25, 2  ;;  %v363_v33 = vadd.f32 %v362_v26, %v361_v18  ;;  %v328_v34 = vrot.slane %v862_v49, 2 }
  0x75   : > { %v290_v35 = vadd.f32 %v289_v27, %v288_v19  ;;  %v315_v36 = vadd.f32 %v314_v29, %v313_v21  ;;  %v322_v37 = vadd.f32 %v321_v30, %v320_v22  ;;  %v273_v43 = vrot.slane %v272_v24, 1 }
  0x76   : > { %v266_v39 = vrot.slane %v265_v31, 1  ;;  %v340_v40 = vadd.f32 %v339_v32, %v338_v25  ;;  %v364_v41 = vrot.slane %v363_v33, 2  ;;  %v298_v45 = vrot.slane %v297_v28, 1 }
  0x77   : > { %v291_v44 = vrot.slane %v290_v35, 1  ;;  %v316_v48 = vrot.slane %v315_v36, 1  ;;  %v343_v59 = vsel %vm260_vm1, %v866_v51, 0.0  ;;  %v323_v62 = vrot.slane %v322_v37, 1 }
  0x78   : > { %v267_v53 = vadd.f32 %v266_v39, %v265_v31  ;;  %v341_v54 = vrot.slane %v340_v40, 1  ;;  %v365_v55 = vadd.f32 %v364_v41, %v363_v33  ;;  %v344_v63 = vrot.slane %v343_v59, 4 }
  0x79   : > { %v292_v60 = vadd.f32 %v291_v44, %v290_v35  ;;  %v317_v61 = vadd.f32 %v316_v48, %v315_v36  ;;  %v368_v58 = vsel %vm260_vm1, %v868_v52, 0.0  ;;  %v274_v2 = vadd.f32 %v273_v43, %v272_v24  ;;  %v408_v36 = vld [vmem:[%s848_s15 + $0x8] sm:$0x7f] }
  0x7a   : > { %v342_v0 = vadd.f32 %v341_v54, %v340_v40  ;;  %v366_v1 = vrot.slane %v365_v55, 1  ;;  %v345_v4 = vadd.f32 %v344_v63, %v343_v59  ;;  %v369_v5 = vrot.slane %v368_v58, 4 }
  0x7b   : > { %v383_v3 = vsel %vm382_vm6, %v267_v53, %v292_v60  ;;  %v299_v6 = vadd.f32 %v298_v45, %v297_v28  ;;  %v378_v8 = vrot.slane %v377_v42, 2  ;;  %v324_v9 = vadd.f32 %v323_v62, %v322_v37 }
  0x7c   : > { %v367_v51 = vadd.f32 %v366_v1, %v365_v55  ;;  %v384_v7 = vsel %vm260_vm1, %v383_v3, %v317_v61  ;;  %v346_v11 = vrot.slane %v345_v4, 2  ;;  %v370_v12 = vadd.f32 %v369_v5, %v368_v58 }
  0x7d   : > { %v386_v10 = vsel %vm385_vm7, %v384_v7, %v342_v0  ;;  %v329_v52 = vadd.f32 %v328_v34, %v862_v49  ;;  %v354_v14 = vadd.f32 %v353_v38, %v864_v50  ;;  %v280_v17 = vrot.slane %v870_v56, 1 }
  0x7e   : > { %v388_v46 = vsel %vm387_vm8, %v386_v10, %v367_v51  ;;  %v347_v13 = vadd.f32 %v346_v11, %v345_v4  ;;  %v371_v15 = vrot.slane %v370_v12, 2  ;;  %v379_v18 = vadd.f32 %v378_v8, %v377_v42 }
  0x7f   : > { %v390_v57 = vsel %vm389_vm9, %v388_v46, %v274_v2  ;;  %v305_v20 = vrot.slane %v304_v47, 1  ;;  %v330_v23 = vrot.slane %v329_v52, 1  ;;  %v355_v49 = vrot.slane %v354_v14, 1 }
  0x80   : > { %v392_v16 = vsel %vm391_vm10, %v390_v57, %v299_v6  ;;  %v348_v21 = vrot.slane %v347_v13, 1  ;;  %v372_v22 = vadd.f32 %v371_v15, %v370_v12  ;;  %v281_v26 = vadd.f32 %v280_v17, %v870_v56 }
  0x81   : > { %v394_v19 = vsel %vm393_vm11, %v392_v16, %v324_v9  ;;  %v380_v50 = vrot.slane %v379_v18, 1  ;;  %v306_v27 = vadd.f32 %v305_v20, %v304_v47  ;;  %v331_v29 = vadd.f32 %v330_v23, %v329_v52 }
  0x82   : > { %v349_v24 = vadd.f32 %v348_v21, %v347_v13  ;;  %v373_v25 = vrot.slane %v372_v22, 1  ;;  %411 = vst [vmem:[%s848_s15] sm:$0xff] %v394_v19  ;;  %v356_v30 = vadd.f32 %v355_v49, %v354_v14 }
  0x83   : > { %v381_v32 = vadd.f32 %v380_v50, %v379_v18 }
  0x84   : > { %v374_v28 = vadd.f32 %v373_v25, %v372_v22 }
  0x86   : > { %v395_v31 = vsel %vm382_vm6, %v349_v24, %v374_v28 }
  0x87   : > { %v396_v33 = vsel %vm260_vm1, %v395_v31, %v281_v26 }
  0x88   : > { %v397_v34 = vsel %vm385_vm7, %v396_v33, %v306_v27 }
  0x89   : > { %v398_v35 = vsel %vm387_vm8, %v397_v34, %v331_v29 }
  0x8a   : > { %v399_v37 = vsel %vm389_vm9, %v398_v35, %v356_v30 }
  0x8b   : > { %v400_v38 = vsel %vm391_vm10, %v399_v37, %v381_v32 }
  0x8c   : > { %v410_v56 = vadd.f32 %v408_v36, %v400_v38 }
  0x8e   : > { %412 = vst [vmem:[%s848_s15 + $0x8] sm:$0x7f] %v410_v56 }
  0x8f PF: > { %s18_s14 = sadd.s32 1, %s720_s14   ;;  %s937_s9 = smov %s704_s10 }
  0x90   : > { %p15_p7 = scmp.ge.s32.totalorder %s18_s14, 4   ;;  %s938_s10 = smov %s708_s11 }
  0x91   : > { %s939_s11 = smov %s787_s20  ;;  %s940_s12 = smov %s716_s13 }
  0x92   : > { %s941_s13 = smov %s943_s16  ;;  %17 = sbr.rel (!%p15_p7) target bundleno = 6 (0x6), region = 89 }
  0x97   :  { %434 = vsyncpa [#allocation3], 1 }
  0x98   :  { %436 = vsyncpa [#allocation3 + $0x1], 1 }
  0x99   :  { %437 = vsyncpa [#allocation5], 1 }
  0x9a   :  { %439 = vsyncpa [#allocation5 + $0x1], 1 }

</bundles_post_ra>
